<compile_context>
chip_gen: v6e
topology: v6e:2x2x1
jax: 0.10.0
libtpu: 0.0.40
codegen_flags: <defaults>
</compile_context>

<pallas_src>
import jax
import jax.numpy as jnp
from jax.experimental import pallas as pl
from jax.experimental.pallas import tpu as pltpu


_SMALL_BYTES = 1 << 20  # below this the kernel is pure overhead; just reshape


def _copy_kernel(x_ref, o_ref):
    # Straight lane-dense copy: identical in/out block shapes, no in-kernel
    # reshape -> pure vld/vst stream at the HBM/DMA roofline.
    o_ref[...] = x_ref[...]


def _vmem_capacity_bytes():
    # Per-generation physical VMEM: 128 MiB on v5e/v6e, 64 MiB per TC on v7x.
    try:
        return int(pltpu.get_tpu_info().vmem_capacity_bytes)
    except Exception:
        return 64 * 1024 * 1024  # conservative fallback (v7x)


def model_forward(weight, *, use_kernel=None):
    """Reproduces Model.forward().

    Args:
      weight: jnp array of shape (1, L, E, K), K = num_labels + 2.
      use_kernel: None -> auto (Pallas copy only for large, lane-dense slabs);
        True / False forces the choice (True still requires N % 128 == 0).

    Returns:
      (payload, seq_lens): payload (1, L, E*K) and seq_lens == [L]
      (the pair a PaddedBatch wraps).
    """
    _, L, E, K = weight.shape
    D = E * K
    N = L * D
    itemsize = jnp.dtype(weight.dtype).itemsize

    # ---- default path: the whole op is a free metadata reshape --------------
    payload = weight.reshape(1, L, D)
    # torch.tensor([length]) defaults to int64; int32 here, identical value.
    seq_lens = jnp.array([L], dtype=jnp.int32)

    if use_kernel is None:
        use_kernel = N * itemsize >= _SMALL_BYTES
    # Kernel path only when the slab can be presented lane-dense (multiple of
    # 128) so stores are unmasked full-width vst.
    if not use_kernel or N % 128 != 0:
        return payload, seq_lens

    # ---- optional Pallas copy (fusion anchor) --------------------------------
    # Lane axis: largest divisor of N that is a multiple of 128, capped at
    # 2048 so the forced minimum 8-row tile (4 * 8 * cols * itemsize <= 512 KiB
    # double-buffered) can never exceed the VMEM limit.
    cols = 128
    for c in (2048, 1024, 512, 256, 128):
        if N % c == 0:
            cols = c
            break
    rows = N // cols
    flat = weight.reshape(rows, cols)  # metadata-only reshape

    vmem_cap = _vmem_capacity_bytes()
    vmem_limit = min((vmem_cap * 3) // 4, 96 * 1024 * 1024)  # headroom below physical
    tile_budget = vmem_limit // 4  # double-buffered in + out ~= 4x tile bytes

    if rows % 8 != 0:
        tl = rows  # whole-extent block: exempt from the (8,128) divisibility rule
    else:
        tl = (tile_budget // (cols * itemsize)) // 8 * 8
        # Keep >= 4 grid blocks so v7x's two TensorCores both stream rows.
        tl = min(tl, max(8, (rows // 4) // 8 * 8))
        tl = min(max(tl, 8), rows)
    grid = (pl.cdiv(rows, tl),)

    copy = pl.pallas_call(
        _copy_kernel,
        out_shape=jax.ShapeDtypeStruct((rows, cols), weight.dtype),
        grid=grid,
        in_specs=[pl.BlockSpec((tl, cols), lambda i: (i, 0))],
        out_specs=pl.BlockSpec((tl, cols), lambda i: (i, 0)),
        # Output buffer is the input buffer: no second N-byte HBM allocation.
        input_output_aliases={0: 0},
        cost_estimate=pl.CostEstimate(
            flops=0, transcendentals=0, bytes_accessed=2 * N * itemsize),
        compiler_params=pltpu.CompilerParams(
            dimension_semantics=("parallel",),  # shard rows across v7x's 2 TCs
            vmem_limit_bytes=vmem_limit,
        ),
    )
    # `flat` is a private temporary (eager reshape produced a fresh buffer),
    # so donating it makes the in/out alias real instead of a defensive copy.
    payload_flat = jax.jit(copy, donate_argnums=0)(flat)

    payload = payload_flat.reshape(1, L, D)  # metadata-only reshape back
    return payload, seq_lens


if __name__ == "__main__":
    # Small shapes consistent with the module's __init__.
    length = 8
    num_events = 4
    num_labels = 6  # K = num_labels + 2 = 8 -> L*E*K = 256

    key = jax.random.PRNGKey(0)
    # Deterministic stand-in for torch.randn(1, length, num_events, num_labels+2)
    weight = jax.random.normal(
        key, (1, length, num_events, num_labels + 2), dtype=jnp.float32
    )

    # Default path: free metadata reshape, no kernel (top perf recommendation).
    payload, seq_lens = model_forward(weight)
    jax.block_until_ready(payload)
    jax.block_until_ready(seq_lens)

    # Also exercise the optional Pallas fusion-anchor path once on TPU.
    payload_k, seq_lens_k = model_forward(weight, use_kernel=True)
    jax.block_until_ready(payload_k)
    jax.block_until_ready(seq_lens_k)

    # Sanity checks against the pure-JAX reference of the forward pass.
    ref_payload = weight.reshape(1, length, -1)
    assert payload.shape == (1, length, num_events * (num_labels + 2))
    assert jnp.array_equal(payload, ref_payload)
    assert jnp.array_equal(payload_k, ref_payload)
    assert int(seq_lens[0]) == length
    assert int(seq_lens_k[0]) == length

    # TODO(synk): PaddedBatch is an external container type; it is returned
    # here as the (payload, seq_lens) tuple it wraps.
    print("KERNEL_OK")
</pallas_src>

<mosaic_0001>
module attributes {stable_mosaic.version = 11 : i64} {
  func.func @_copy_kernel(%arg0: i32, %arg1: memref<1x256xf32, #tpu.memory_space<vmem>>, %arg2: memref<1x256xf32, #tpu.memory_space<vmem>>) attributes {dimension_semantics = [#tpu.dimension_semantics<parallel>], iteration_bounds = array<i64: 1>, scalar_prefetch = 0 : i64, scratch_operands = 0 : i64, tpu.core_type = #tpu.core_type<tc>, window_params = [{transform_indices = @transform_0, window_bounds = array<i64: 1, 256>}, {transform_indices = @transform_1, window_bounds = array<i64: 1, 256>}]} {
    %c0 = arith.constant 0 : index
    %c0_0 = arith.constant 0 : index
    %0 = vector.load %arg1[%c0, %c0_0] : memref<1x256xf32, #tpu.memory_space<vmem>>, vector<1x256xf32>
    %c0_1 = arith.constant 0 : index
    %c0_2 = arith.constant 0 : index
    %1 = vector.load %arg2[%c0_1, %c0_2] : memref<1x256xf32, #tpu.memory_space<vmem>>, vector<1x256xf32>
    tpu.vector_store %arg2[%c0_1, %c0_2], %0 {strides = array<i32>} : memref<1x256xf32, #tpu.memory_space<vmem>>, vector<1x256xf32>,
    return
  }
  func.func @transform_0(%arg0: i32) -> (i32, i32) {
    %c0_i32 = arith.constant 0 : i32
    %c0_i32_0 = arith.constant 0 : i32
    return %arg0, %c0_i32 : i32, i32
  }
  func.func @transform_1(%arg0: i32) -> (i32, i32) {
    %c0_i32 = arith.constant 0 : i32
    %c0_i32_0 = arith.constant 0 : i32
    return %arg0, %c0_i32 : i32, i32
  }
}

</mosaic_0001>

<bundles_post_ra>
// kernel: tpu_custom_call.1
= control target key start
LH: loop header
LB: loop body
LE: loop exit
PB: predicated region body
PF: predicated region fallthrough
CT: control target
= control target key end

     0   :  { %6 = vsyncpa [#allocation3], 0  ;;  %s106_s0 = inlined_call_operand.hbm [shape: f32[1,256], index: 0, kind: input, shape index: {}, may-alias: {0,1}]   ;;  %s107_s1 = inlined_call_operand.hbm [shape: f32[1,256], index: 1, kind: output, shape index: {}, may-alias: {0,1}]  }
   0x1   :  { %7 = vsyncpa [#allocation4], 0  ;;  %s88_s6 = smov [#allocation2]  }
   0x2   :  { %s14_s7 = sshll.u32 %s88_s6, 4  ;;  %s15_s7 = int_to_ptr.vmem [resolvable:$true] %s14_s7 }
   0x3   :  { %s52_s8 = scalar_lea.vmem %s15_s7, 32  ;;  %p57_p1 = scmp.lt.s32.totalorder %s15_s7, %s15_s7 }
   0x4   :  { %p53_p0 = scmp.ne.s32.totalorder %s15_s7, %s52_s8  ;;  %p58_p2 = scmp.lt.s32.totalorder %s52_s8, %s52_s8 }
   0x6   :  { %p59_p3 = por %p58_p2, %p57_p1 }
   0x8   :  { %p60_p4 = pnand %p59_p3, %p53_p0 }
   0xa   :  { %63 = shalt.err (!%p60_p4)
}
   0xb   :  { %17 = dma.hbm_to_vmem [thread:$0]  %s106_s0, 32, %s15_s7, [#allocation3]  }
   0xc   :  { %84 = dma.done.wait [#allocation3], 32  }
   0xd   :  { %85 = vsyncadd [#allocation3], 4294967264  ;;  %v22_v0 = vlaneseq  ;;  %s89_s11 = smov [#allocation5]   ;;  %v21_v1 = vld [vmem:[#allocation2] sm:$0x3] }
   0xe   :  { %s33_s12 = sshll.u32 %s89_s11, 4  ;;  %s34_s12 = int_to_ptr.vmem [resolvable:$true] %s33_s12 }
   0xf   :  { %vm24_vm0 = vcmp.lt.s32.totalorder %v22_v0, 256  ;;  %s64_s13 = scalar_lea.vmem %s34_s12, 32  ;;  %p69_p6 = scmp.lt.s32.totalorder %s34_s12, %s34_s12 }
  0x10   :  { %26 = vst.msk [vmem:[#allocation5] sm:$0x3] %vm24_vm0, %v21_v1  ;;  %p65_p5 = scmp.ne.s32.totalorder %s34_s12, %s64_s13  ;;  %p70_p7 = scmp.lt.s32.totalorder %s64_s13, %s64_s13 }
  0x12   :  { %p71_p8 = por %p70_p7, %p69_p6 }
  0x14   :  { %p72_p9 = pnand %p71_p8, %p65_p5 }
  0x16   :  { %75 = shalt.err (!%p72_p9)
}
  0x17   :  { %36 = dma.vmem_to_hbm [thread:$0]  %s34_s12, 32, %s107_s1, [#allocation4]  }
  0x18   :  { %86 = dma.done.wait [#allocation4], 32  }
  0x19   :  { %87 = vsyncadd [#allocation4], 4294967264 }
  0x1a   :  { %40 = vsyncpa [#allocation3], 1 }
  0x1b   :  { %41 = vsyncpa [#allocation4], 1 }

</bundles_post_ra>
